<compile_context>
chip_gen: v6e
topology: v6e:2x2x1
jax: 0.10.0
libtpu: 0.0.40
codegen_flags: <defaults>
</compile_context>

<pallas_src>
import functools

import numpy as np
import jax
import jax.numpy as jnp
from jax import lax
from jax.experimental import pallas as pl
from jax.experimental.pallas import tpu as pltpu

TEMPERATURE = 0.05


def _log1p_stable(x):
    """log1p(x) from guaranteed-lowering ops (log/div/where); x >= 0 here."""
    u = 1.0 + x
    d = u - 1.0
    y = jnp.log(u) * (x / jnp.where(d == 0.0, 1.0, d))
    return jnp.where(d == 0.0, x, y)


def _vascl_block_kernel(f_all_ref, adj_ref, out_ref, *, inv_temp, batch):
    """One row-block of the VaSCL N-pair bidirectional loss.

    f_all_ref: [2*Bp, D]  rows [0,Bp) = view 1, rows [Bp,2Bp) = view 2.
                          Constant index_map -> resident in VMEM, DMA'd once.
    adj_ref:   [TB, K]    full-column hard-negative indices for this block.
    out_ref:   [8, 128]   per-block partial loss sum at [0,0], zeros elsewhere.
    """
    two_bp, _ = f_all_ref.shape
    bp = two_bp // 2
    tb, k = adj_ref.shape

    i = pl.program_id(0)
    row0 = pl.multiple_of(i * tb, tb)            # view-1 rows of this block
    row0_v2 = pl.multiple_of(bp + i * tb, tb)    # view-2 rows (Bp % TB == 0)

    f_all = f_all_ref[...]                                   # [2Bp, D]
    f1_blk = f_all_ref[pl.ds(row0, tb), :]                   # [TB, D]
    f2_blk = f_all_ref[pl.ds(row0_v2, tb), :]                # [TB, D]

    # Positive similarity per row (tiny elementwise work, f32 accumulation).
    s_pos = jnp.sum(f1_blk.astype(jnp.float32) * f2_blk.astype(jnp.float32),
                    axis=-1, keepdims=True)                  # [TB, 1]

    # All-pairs similarities on the MXU: [TB, D] x [2Bp, D]^T -> [TB, 2Bp].
    dims = (((1,), (1,)), ((), ()))
    s1 = lax.dot_general(f1_blk, f_all, dims,
                         preferred_element_type=jnp.float32)  # [TB, 2Bp]
    s2 = lax.dot_general(f2_blk, f_all, dims,
                         preferred_element_type=jnp.float32)  # [TB, 2Bp]

    # exp((s - s_pos)/T): shifted by the positive logit (numerically stable),
    # lane-dense over 2Bp columns (EUP).
    p1 = jnp.exp((s1 - s_pos) * inv_temp)
    p2 = jnp.exp((s2 - s_pos) * inv_temp)

    # Zero padded / out-of-range rows BEFORE any masked reduction so garbage
    # (inf/NaN) never reaches a sum.
    row_ids = i * tb + lax.broadcasted_iota(jnp.int32, (tb, 1), 0)
    row_valid = row_ids < batch                               # [TB, 1]
    p1 = jnp.where(row_valid, p1, 0.0)
    p2 = jnp.where(row_valid, p2, 0.0)

    # Hard-negative selection mask over the Bp columns, built from the K
    # per-row indices.  logical_or == torch scatter-then->0 semantics (dupes
    # count once).  K is small and static.
    adj = adj_ref[...]                                        # [TB, K] int32
    col = lax.broadcasted_iota(jnp.int32, (tb, bp), 1)
    m = col == adj[:, 0:1]
    for kk in range(1, k):
        m = jnp.logical_or(m, col == adj[:, kk:kk + 1])
    mask = m.astype(jnp.float32)                              # [TB, Bp]

    # Ng/pos per view: fold the two column halves (f1-negatives + f2-negatives
    # share the same column set), then masked lane reduce.
    r1 = jnp.sum((p1[:, :bp] + p1[:, bp:]) * mask, axis=-1, keepdims=True)
    r2 = jnp.sum((p2[:, :bp] + p2[:, bp:]) * mask, axis=-1, keepdims=True)

    # -log(pos/(Ng+pos)) = log1p(Ng/pos), summed over both views and rows.
    per_row = _log1p_stable(r1) + _log1p_stable(r2)           # [TB, 1]
    block_sum = jnp.sum(per_row)                              # scalar

    # Parallel partial sums: each grid step owns its own lane-dense (8,128)
    # output block; the scalar lands at [0,0], zeros elsewhere.
    r_io = lax.broadcasted_iota(jnp.int32, (8, 128), 0)
    c_io = lax.broadcasted_iota(jnp.int32, (8, 128), 1)
    out_ref[...] = jnp.where((r_io == 0) & (c_io == 0), block_sum, 0.0)


def vascl_nbidir_loss(features_1, features_2, hard_indices,
                      temperature=TEMPERATURE, block_rows=None):
    """JAX/Pallas equivalent of VaSCL_NBiDir.forward. Returns {'lds_loss': scalar}.

    Features are shipped in their given dtype (pass bf16 to halve HBM traffic);
    all in-kernel accumulation is f32.
    """
    B, D = features_1.shape
    K = hard_indices.shape[1]
    in_dtype = features_1.dtype
    itemsize = jnp.dtype(in_dtype).itemsize

    # hard_indices index the compacted row of length B-1 (diagonal removed);
    # compact index h maps to full column h + (h >= row).
    hard_indices = hard_indices.astype(jnp.int32)
    rows = jnp.arange(B, dtype=jnp.int32)[:, None]
    adj = hard_indices + (hard_indices >= rows).astype(jnp.int32)       # [B, K]

    # Row-block size: conservative VMEM budget (fits v5e's 16 MiB default
    # scoped limit): ~4 f32 copies of the [., 2B] logit/exp tiles per row.
    if block_rows is None:
        bytes_per_row = 4 * (4 * 2 * B + 2 * D + K)
        budget = 4 * 1024 * 1024
        block_rows = max(8, min(512, budget // max(bytes_per_row, 1)))
    block_rows = min(block_rows, ((B + 7) // 8) * 8)
    block_rows = max(8, (block_rows // 8) * 8)        # sublane-aligned tile
    n_blocks = pl.cdiv(B, block_rows)
    Bp = n_blocks * block_rows                        # padded batch (Bp % TB == 0)

    # Zero-pad both views to Bp rows and stack -> [2*Bp, D]; padded rows are
    # masked out in-kernel and zero rows are never selected for valid rows.
    pad = Bp - B
    f1p = jnp.pad(features_1, ((0, pad), (0, 0)))
    f2p = jnp.pad(features_2, ((0, pad), (0, 0)))
    f_all = jnp.concatenate([f1p, f2p], axis=0).astype(in_dtype)         # [2Bp, D]
    adj_p = jnp.pad(adj, ((0, pad), (0, 0)))                             # [Bp, K]

    kernel = functools.partial(_vascl_block_kernel,
                               inv_temp=1.0 / temperature, batch=B)

    # Advisory cost hints (two [TB,D]x[D,2Bp] MXU matmuls per block).
    flops = 8 * Bp * Bp * D
    transcendentals = 4 * Bp * Bp + 4 * Bp
    bytes_accessed = 2 * Bp * D * itemsize + Bp * K * 4 + n_blocks * 8 * 128 * 4

    # VMEM: resident feature table (double-buffered) + per-block temporaries.
    vmem_est = (2 * (2 * Bp * D * itemsize)
                + 2 * (block_rows * K * 4)
                + 6 * (block_rows * 2 * Bp * 4)
                + 2 * (8 * 128 * 4))
    vmem_limit = int(min(max(2 * vmem_est, 32 * 1024 * 1024), 60 * 1024 * 1024))

    out = pl.pallas_call(
        kernel,
        out_shape=jax.ShapeDtypeStruct((8 * n_blocks, 128), jnp.float32),
        grid=(n_blocks,),
        in_specs=[
            pl.BlockSpec((2 * Bp, D), lambda i: (0, 0)),       # resident, DMA'd once
            pl.BlockSpec((block_rows, K), lambda i: (i, 0)),   # per-block indices
        ],
        out_specs=pl.BlockSpec((8, 128), lambda i: (i, 0)),    # parallel partials
        compiler_params=pltpu.CompilerParams(
            dimension_semantics=("parallel",),
            vmem_limit_bytes=vmem_limit),
        cost_estimate=pl.CostEstimate(
            flops=flops, transcendentals=transcendentals,
            bytes_accessed=bytes_accessed),
    )(f_all, adj_p)

    loss = jnp.sum(out) * (1.0 / (2.0 * B))
    return {"lds_loss": loss}


def _reference_numpy(f1, f2, hard_indices, temperature=TEMPERATURE):
    """Literal re-implementation of the torch forward (masked_select path)."""
    f1 = np.asarray(f1, np.float32)
    f2 = np.asarray(f2, np.float32)
    hi = np.asarray(hard_indices)
    B = f1.shape[0]
    feats = np.concatenate([f1, f2], axis=0)
    mask = ~np.tile(np.eye(B, dtype=bool), (2, 2))
    pos = np.exp(np.sum(f1 * f2, axis=-1) / temperature)
    pos = np.concatenate([pos, pos], axis=0)
    neg = np.exp(feats @ feats.T / temperature)
    neg_sel = neg[mask].reshape(2 * B, -1)
    hm = np.zeros((B, B - 1), dtype=bool)
    hm[np.arange(B)[:, None], hi] = True
    hm = np.tile(hm, (2, 2))
    hardneg = neg_sel[hm].reshape(2 * B, -1)
    ng = hardneg.sum(axis=-1)
    return float(np.mean(-np.log(pos / (ng + pos))))


if __name__ == "__main__":
    B, D, K = 16, 32, 3  # batch, embedding dim, hard negatives per row

    key = jax.random.PRNGKey(0)
    k1, k2, k3 = jax.random.split(key, 3)
    f1 = jax.random.normal(k1, (B, D), dtype=jnp.float32)
    f2 = jax.random.normal(k2, (B, D), dtype=jnp.float32)
    # L2-normalize (VaSCL uses normalized embeddings; keeps exp(sim/T) finite).
    f1 = f1 / jnp.linalg.norm(f1, axis=-1, keepdims=True)
    f2 = f2 / jnp.linalg.norm(f2, axis=-1, keepdims=True)
    # unique hard-negative indices per row, values in [0, B-1)
    hard_indices = jnp.argsort(jax.random.uniform(k3, (B, B - 1)), axis=1)[:, :K]
    hard_indices = hard_indices.astype(jnp.int32)

    # block_rows=8 forces a 2-step grid so tiling / partial-sum paths are used.
    result = vascl_nbidir_loss(f1, f2, hard_indices, block_rows=8)
    loss = jax.block_until_ready(result["lds_loss"])

    ref = _reference_numpy(f1, f2, hard_indices)
    # Tolerance allows for reduced-precision MXU passes on f32 matmuls; real
    # structural errors (wrong mask / indices) are orders of magnitude larger.
    np.testing.assert_allclose(float(loss), ref, rtol=2e-2, atol=1e-4)

    print("KERNEL_OK")
</pallas_src>

<mosaic_0001>
module attributes {stable_mosaic.version = 11 : i64} {
  func.func @_vascl_block_kernel(%arg0: i32, %arg1: memref<32x32xf32, #tpu.memory_space<vmem>>, %arg2: memref<8x3xi32, #tpu.memory_space<vmem>>, %arg3: memref<8x128xf32, #tpu.memory_space<vmem>>) attributes {dimension_semantics = [#tpu.dimension_semantics<parallel>], iteration_bounds = array<i64: 2>, scalar_prefetch = 0 : i64, scratch_operands = 0 : i64, tpu.core_type = #tpu.core_type<tc>, window_params = [{pipeline_mode = #tpu.pipeline_mode<synchronous>, transform_indices = @transform_0, window_bounds = array<i64: 32, 32>}, {transform_indices = @transform_1, window_bounds = array<i64: 8, 3>}, {transform_indices = @transform_2, window_bounds = array<i64: 8, 128>}]} {
    %c8_i32 = arith.constant 8 : i32
    %0 = arith.muli %arg0, %c8_i32 : i32
    %1 = tpu.assume_multiple %0, 8 : i32
    %c8_i32_0 = arith.constant 8 : i32
    %2 = arith.muli %arg0, %c8_i32_0 : i32
    %c16_i32 = arith.constant 16 : i32
    %3 = arith.addi %c16_i32, %2 : i32
    %4 = tpu.assume_multiple %3, 8 : i32
    %c0 = arith.constant 0 : index
    %c0_1 = arith.constant 0 : index
    %5 = vector.load %arg1[%c0, %c0_1] : memref<32x32xf32, #tpu.memory_space<vmem>>, vector<32x32xf32>
    %6 = arith.index_cast %1 : i32 to index
    %c0_2 = arith.constant 0 : index
    %7 = vector.load %arg1[%6, %c0_2] : memref<32x32xf32, #tpu.memory_space<vmem>>, vector<8x32xf32>
    %8 = arith.index_cast %4 : i32 to index
    %c0_3 = arith.constant 0 : index
    %9 = vector.load %arg1[%8, %c0_3] : memref<32x32xf32, #tpu.memory_space<vmem>>, vector<8x32xf32>
    %10 = arith.mulf %7, %9 : vector<8x32xf32>
    %cst = arith.constant dense<0.000000e+00> : vector<8xf32>
    %11 = vector.multi_reduction <add>, %10, %cst [1] : vector<8x32xf32> to vector<8xf32>
    %12 = vector.shape_cast %11 : vector<8xf32> to vector<8x1xf32>
    %cst_4 = arith.constant dense<0.000000e+00> : vector<8x32xf32>
    %13 = tpu.matmul %7, %5, %cst_4 {dimension_numbers = #tpu.dot_dimension_numbers<[1], [1], [0], [0], [0, 0, 1, 0], [], []>} : vector<8x32xf32>, vector<32x32xf32>, vector<8x32xf32> -> vector<8x32xf32>
    %cst_5 = arith.constant dense<0.000000e+00> : vector<8x32xf32>
    %14 = tpu.matmul %9, %5, %cst_5 {dimension_numbers = #tpu.dot_dimension_numbers<[1], [1], [0], [0], [0, 0, 1, 0], [], []>} : vector<8x32xf32>, vector<32x32xf32>, vector<8x32xf32> -> vector<8x32xf32>
    %15 = vector.broadcast %12 : vector<8x1xf32> to vector<8x32xf32>
    %16 = arith.subf %13, %15 : vector<8x32xf32>
    %cst_6 = arith.constant 2.000000e+01 : f32
    %17 = vector.broadcast %cst_6 : f32 to vector<8x32xf32>
    %18 = arith.mulf %16, %17 : vector<8x32xf32>
    %19 = math.exp %18 : vector<8x32xf32>
    %20 = vector.broadcast %12 : vector<8x1xf32> to vector<8x32xf32>
    %21 = arith.subf %14, %20 : vector<8x32xf32>
    %cst_7 = arith.constant 2.000000e+01 : f32
    %22 = vector.broadcast %cst_7 : f32 to vector<8x32xf32>
    %23 = arith.mulf %21, %22 : vector<8x32xf32>
    %24 = math.exp %23 : vector<8x32xf32>
    %c8_i32_8 = arith.constant 8 : i32
    %25 = arith.muli %arg0, %c8_i32_8 : i32
    %26 = tpu.iota {dimensions = array<i32: 0>} : vector<8x1xi32>
    %27 = vector.broadcast %25 : i32 to vector<8x1xi32>
    %28 = arith.addi %27, %26 : vector<8x1xi32>
    %c16_i32_9 = arith.constant 16 : i32
    %29 = vector.broadcast %c16_i32_9 : i32 to vector<8x1xi32>
    %30 = arith.cmpi slt, %28, %29 : vector<8x1xi32>
    %cst_10 = arith.constant 0.000000e+00 : f32
    %31 = vector.shape_cast %30 : vector<8x1xi1> to vector<8x1xi1>
    %32 = vector.broadcast %31 : vector<8x1xi1> to vector<8x32xi1>
    %33 = vector.broadcast %cst_10 : f32 to vector<8x32xf32>
    %34 = arith.select %32, %19, %33 : vector<8x32xi1>, vector<8x32xf32>
    %cst_11 = arith.constant 0.000000e+00 : f32
    %35 = vector.shape_cast %30 : vector<8x1xi1> to vector<8x1xi1>
    %36 = vector.broadcast %35 : vector<8x1xi1> to vector<8x32xi1>
    %37 = vector.broadcast %cst_11 : f32 to vector<8x32xf32>
    %38 = arith.select %36, %24, %37 : vector<8x32xi1>, vector<8x32xf32>
    %c0_12 = arith.constant 0 : index
    %c0_13 = arith.constant 0 : index
    %39 = vector.load %arg2[%c0_12, %c0_13] : memref<8x3xi32, #tpu.memory_space<vmem>>, vector<8x3xi32>
    %40 = tpu.iota {dimensions = array<i32: 1>} : vector<8x16xi32>
    %41 = vector.extract_strided_slice %39 {offsets = [0, 0], sizes = [8, 1], strides = [1, 1]} : vector<8x3xi32> to vector<8x1xi32>
    %42 = vector.broadcast %41 : vector<8x1xi32> to vector<8x16xi32>
    %43 = arith.cmpi eq, %40, %42 : vector<8x16xi32>
    %44 = vector.extract_strided_slice %39 {offsets = [0, 1], sizes = [8, 1], strides = [1, 1]} : vector<8x3xi32> to vector<8x1xi32>
    %45 = vector.broadcast %44 : vector<8x1xi32> to vector<8x16xi32>
    %46 = arith.cmpi eq, %40, %45 : vector<8x16xi32>
    %47 = arith.ori %43, %46 : vector<8x16xi1>
    %48 = vector.extract_strided_slice %39 {offsets = [0, 2], sizes = [8, 1], strides = [1, 1]} : vector<8x3xi32> to vector<8x1xi32>
    %49 = vector.broadcast %48 : vector<8x1xi32> to vector<8x16xi32>
    %50 = arith.cmpi eq, %40, %49 : vector<8x16xi32>
    %51 = arith.ori %47, %50 : vector<8x16xi1>
    %52 = arith.extui %51 : vector<8x16xi1> to vector<8x16xi32>
    %53 = arith.sitofp %52 : vector<8x16xi32> to vector<8x16xf32>
    %54 = vector.extract_strided_slice %34 {offsets = [0, 0], sizes = [8, 16], strides = [1, 1]} : vector<8x32xf32> to vector<8x16xf32>
    %55 = vector.extract_strided_slice %34 {offsets = [0, 16], sizes = [8, 16], strides = [1, 1]} : vector<8x32xf32> to vector<8x16xf32>
    %56 = arith.addf %54, %55 : vector<8x16xf32>
    %57 = arith.mulf %56, %53 : vector<8x16xf32>
    %cst_14 = arith.constant dense<0.000000e+00> : vector<8xf32>
    %58 = vector.multi_reduction <add>, %57, %cst_14 [1] : vector<8x16xf32> to vector<8xf32>
    %59 = vector.shape_cast %58 : vector<8xf32> to vector<8x1xf32>
    %60 = vector.extract_strided_slice %38 {offsets = [0, 0], sizes = [8, 16], strides = [1, 1]} : vector<8x32xf32> to vector<8x16xf32>
    %61 = vector.extract_strided_slice %38 {offsets = [0, 16], sizes = [8, 16], strides = [1, 1]} : vector<8x32xf32> to vector<8x16xf32>
    %62 = arith.addf %60, %61 : vector<8x16xf32>
    %63 = arith.mulf %62, %53 : vector<8x16xf32>
    %cst_15 = arith.constant dense<0.000000e+00> : vector<8xf32>
    %64 = vector.multi_reduction <add>, %63, %cst_15 [1] : vector<8x16xf32> to vector<8xf32>
    %65 = vector.shape_cast %64 : vector<8xf32> to vector<8x1xf32>
    %cst_16 = arith.constant 1.000000e+00 : f32
    %66 = vector.broadcast %cst_16 : f32 to vector<8x1xf32>
    %67 = arith.addf %66, %59 : vector<8x1xf32>
    %cst_17 = arith.constant 1.000000e+00 : f32
    %68 = vector.broadcast %cst_17 : f32 to vector<8x1xf32>
    %69 = arith.subf %67, %68 : vector<8x1xf32>
    %70 = math.log %67 : vector<8x1xf32>
    %cst_18 = arith.constant 0.000000e+00 : f32
    %71 = vector.broadcast %cst_18 : f32 to vector<8x1xf32>
    %72 = arith.cmpf oeq, %69, %71 : vector<8x1xf32>
    %cst_19 = arith.constant 1.000000e+00 : f32
    %73 = vector.broadcast %cst_19 : f32 to vector<8x1xf32>
    %74 = arith.select %72, %73, %69 : vector<8x1xi1>, vector<8x1xf32>
    %75 = arith.divf %59, %74 : vector<8x1xf32>
    %76 = arith.mulf %70, %75 : vector<8x1xf32>
    %cst_20 = arith.constant 0.000000e+00 : f32
    %77 = vector.broadcast %cst_20 : f32 to vector<8x1xf32>
    %78 = arith.cmpf oeq, %69, %77 : vector<8x1xf32>
    %79 = arith.select %78, %59, %76 : vector<8x1xi1>, vector<8x1xf32>
    %cst_21 = arith.constant 1.000000e+00 : f32
    %80 = vector.broadcast %cst_21 : f32 to vector<8x1xf32>
    %81 = arith.addf %80, %65 : vector<8x1xf32>
    %cst_22 = arith.constant 1.000000e+00 : f32
    %82 = vector.broadcast %cst_22 : f32 to vector<8x1xf32>
    %83 = arith.subf %81, %82 : vector<8x1xf32>
    %84 = math.log %81 : vector<8x1xf32>
    %cst_23 = arith.constant 0.000000e+00 : f32
    %85 = vector.broadcast %cst_23 : f32 to vector<8x1xf32>
    %86 = arith.cmpf oeq, %83, %85 : vector<8x1xf32>
    %cst_24 = arith.constant 1.000000e+00 : f32
    %87 = vector.broadcast %cst_24 : f32 to vector<8x1xf32>
    %88 = arith.select %86, %87, %83 : vector<8x1xi1>, vector<8x1xf32>
    %89 = arith.divf %65, %88 : vector<8x1xf32>
    %90 = arith.mulf %84, %89 : vector<8x1xf32>
    %cst_25 = arith.constant 0.000000e+00 : f32
    %91 = vector.broadcast %cst_25 : f32 to vector<8x1xf32>
    %92 = arith.cmpf oeq, %83, %91 : vector<8x1xf32>
    %93 = arith.select %92, %65, %90 : vector<8x1xi1>, vector<8x1xf32>
    %94 = arith.addf %79, %93 : vector<8x1xf32>
    %95 = vector.shape_cast %94 : vector<8x1xf32> to vector<1x8x1xf32>
    %cst_26 = arith.constant dense<0.000000e+00> : vector<1xf32>
    %96 = vector.multi_reduction <add>, %95, %cst_26 [1, 2] : vector<1x8x1xf32> to vector<1xf32>
    %97 = vector.shape_cast %96 : vector<1xf32> to vector<1x1x1xf32>
    %98 = vector.extract %97[0, 0, 0] : f32 from vector<1x1x1xf32>
    %99 = tpu.iota {dimensions = array<i32: 0>} : vector<8x128xi32>
    %100 = tpu.iota {dimensions = array<i32: 1>} : vector<8x128xi32>
    %c0_i32 = arith.constant 0 : i32
    %101 = vector.broadcast %c0_i32 : i32 to vector<8x128xi32>
    %102 = arith.cmpi eq, %99, %101 : vector<8x128xi32>
    %c0_i32_27 = arith.constant 0 : i32
    %103 = vector.broadcast %c0_i32_27 : i32 to vector<8x128xi32>
    %104 = arith.cmpi eq, %100, %103 : vector<8x128xi32>
    %105 = arith.andi %102, %104 : vector<8x128xi1>
    %cst_28 = arith.constant 0.000000e+00 : f32
    %106 = vector.broadcast %98 : f32 to vector<8x128xf32>
    %107 = vector.broadcast %cst_28 : f32 to vector<8x128xf32>
    %108 = arith.select %105, %106, %107 : vector<8x128xi1>, vector<8x128xf32>
    %c0_29 = arith.constant 0 : index
    %c0_30 = arith.constant 0 : index
    %109 = vector.load %arg3[%c0_29, %c0_30] : memref<8x128xf32, #tpu.memory_space<vmem>>, vector<8x128xf32>
    tpu.vector_store %arg3[%c0_29, %c0_30], %108 {strides = array<i32>} : memref<8x128xf32, #tpu.memory_space<vmem>>, vector<8x128xf32>,
    return
  }
  func.func @transform_0(%arg0: i32) -> (i32, i32) {
    %c0_i32 = arith.constant 0 : i32
    %c0_i32_0 = arith.constant 0 : i32
    %c0_i32_1 = arith.constant 0 : i32
    return %c0_i32, %c0_i32_0 : i32, i32
  }
  func.func @transform_1(%arg0: i32) -> (i32, i32) {
    %c0_i32 = arith.constant 0 : i32
    %c0_i32_0 = arith.constant 0 : i32
    return %arg0, %c0_i32 : i32, i32
  }
  func.func @transform_2(%arg0: i32) -> (i32, i32) {
    %c0_i32 = arith.constant 0 : i32
    %c0_i32_0 = arith.constant 0 : i32
    return %arg0, %c0_i32 : i32, i32
  }
}

</mosaic_0001>

<bundles_post_ra>
// kernel: tpu_custom_call.1
= control target key start
LH: loop header
LB: loop body
LE: loop exit
PB: predicated region body
PF: predicated region fallthrough
CT: control target
= control target key end

     0   :  { %7 = vsyncpa [#allocation3], 0  ;;  %s913_s0 = inlined_call_operand.hbm [shape: f32[32,32], index: 0, kind: input, shape index: {}]   ;;  %s914_s1 = inlined_call_operand.vmem [shape: s32[16,3], index: 1, kind: input, shape index: {}]   ;;  %s915_s2 = inlined_call_operand.hbm [shape: f32[16,128], index: 2, kind: output, shape index: {}]  }
   0x1   :  { %8 = vsyncpa [#allocation4], 0 }
   0x2   :  { %10 = vsyncpa [#allocation4 + $0x1], 0  ;;  %s763_s9 = smov 0   ;;  %s765_s10 = smov 0  }
   0x3   :  { %s767_s11 = smov 0   ;;  %s769_s12 = smov 0  }
   0x4 LB: > { %s784_s13 = sadd.s32 4294967295, %s736_s12   ;;  %s510_s14 = sadd.s32 4294967294, %s736_s12   ;;  %s736_s12 = sphi %s769_s12, %s923_s12   ;;  %s732_s11 = sphi %s767_s11, %s922_s11   ;;  %s728_s10 = sphi %s765_s10, %s921_s10   ;;  %s724_s9 = sphi %s763_s9, %s920_s9  }
   0x5   : > { %s788_s15 = sadd.s32 1, %s736_s12   ;;  %s70_s16 = sadd.s32 1, %s732_s11 }
   0x6   : > { %s67_s17 = ssub.s32 %s736_s12, %s788_s15  ;;  %p80_p0 = scmp.ne.s32.totalorder %s732_s11, %s728_s10 }
   0x7   : > { %p68_p1 = scmp.eq.s32.totalorder %s67_s17, 0  ;;  %p81_p2 = scmp.eq.s32.totalorder %s784_s13, 1 }
   0x8   : > { %p86_p3 = scmp.ne.s32.totalorder %s728_s10, %s724_s9  ;;  %p87_p4 = scmp.eq.s32.totalorder %s510_s14, 1 }
   0x9   : > { %s799_s18 = scalar_select %p68_p1, %s732_s11, %s70_s16  }
   0xa   : > { %p801_p5 = por %p81_p2, %p80_p0  ;;  %p805_p6 = por %p87_p4, %p86_p3 }
   0xb   : > { %p511_p7 = scmp.ge.s32.totalorder %s736_s12, 1  ;;  %p94_p8 = scmp.lt.s32.totalorder %s736_s12, 3 }
   0xc   : > { %s917_s20 = scalar_select %p805_p6, 1, 0 }
   0xd   : > { %p586_p9 = scmp.eq.s32.totalorder %s784_s13, 0  ;;  %p812_p10 = pnand %p511_p7, %p94_p8 }
   0xe   : > { %s738_s22 = smov [#allocation2]  }
   0xf   : > { %s106_s23 = sshll.u32 %s738_s22, 4  ;;  %p578_p11 = pneg %p812_p10  ;;  %s107_s23 = int_to_ptr.vmem [resolvable:$true] %s106_s23 }
  0x10   : > { %s657_s24 = scalar_lea.vmem %s107_s23, 512  ;;  %p665_p3 = scmp.lt.s32.totalorder %s107_s23, %s107_s23 }
  0x11   : > { %p579_p12 = pnand %p586_p9, %p578_p11  ;;  %p658_p0 = scmp.ne.s32.totalorder %s107_s23, %s657_s24 }
  0x12   : > { %p666_p4 = scmp.lt.s32.totalorder %s657_s24, %s657_s24 }
  0x13   : > { %p648_p13 = pneg %p579_p12 }
  0x14   : > { %p667_p6 = por %p666_p4, %p665_p3 }
  0x15   : > { %p660_p1 = pnand %p658_p0, %p648_p13 }
  0x17   : > { %p661_p2 = pneg %p660_p1 }
  0x19   : > { %p668_p7 = pnand %p667_p6, %p661_p2 }
  0x1b   : > { %671 = shalt.err (!%p668_p7)
}
  0x1c   : > { %s739_s25 = smov 128   ;;  %s740_s26 = smov 8  }
  0x1d   : > { %581 = dma.hbm_to_vmem [thread:$0]  (!%p579_p12), %s913_s0, 512, %s107_s23, [#allocation3], %s739_s25, %s739_s25, %s740_s26  }
  0x1e   : > { %129 = sbr.rel (%p812_p10) target bundleno = 773 (0x305), region = 28 }
  0x23   : > { %715 = dma.done.wait (%p586_p9), [#allocation3], 512  }
  0x24   : > { %717 = vsyncadd (%p586_p9), [#allocation3], 4294966784  ;;  %v741_v0 = vmov 0.0   ;;  %p150_p6 = scmp.lt.s32.totalorder %s784_s13, 1  ;;  %vm742_vm0 = vmmov 0   ;;  %s518_s29 = sshll.u32 %s784_s13, 3  ;;  %v335_v24 = vlaneseq }
  0x25   : > { %548 = vmatprep.subr.mxu0 %v741_v0  ;;  %559 = vmatprep.subr.mxu1 %v741_v0  ;;  %v743_v1 = vmov 1   ;;  %vm165_vm1 = vcmask 261120   ;;  %v159_v2 = vld [vmem:[#allocation2 + $0x18] sm:$0xff]  ;;  %s160_s7 = scalar_lea.vmem [#allocation2], %s518_s29  ;;  %v158_v5 = vld [vmem:[#allocation2 + $0x10] sm:$0xff]  ;;  %v157_v9 = vld [vmem:[#allocation2 + $0x8] sm:$0xff]  ;;  %v337_v26 = vstv %s518_s29 }
  0x26   : > { %556 = vmatprep.mubr.msk.f32.mxu0 %vm742_vm0, %v741_v0  ;;  %567 = vmatprep.mubr.msk.f32.mxu1 %vm742_vm0, %v741_v0  ;;  %s151_s30 = scalar_select %p150_p6, %s784_s13, 1  ;;  %v161_v3 = vld [vmem:[%s160_s7] sm:$0xff]  ;;  %v520_v4 = vld [vmem:[%s160_s7 + $0x10] sm:$0xff]  ;;  %v744_v11 = vmov 0   ;;  %v745_v12 = vmov 2   ;;  %v858_v25 = vshrl.u32 %v335_v24, 7 }
  0x27   : > { %631 = vset.pattern.permute.xlu1 %v743_v1  ;;  %549 = vmatpush3.xpose.msk.msra.mxu0 %vm165_vm1, %v159_v2  ;;  %v164_v6 = vmul.f32 %v520_v4, %v161_v3  ;;  %v156_v10 = vld [vmem:[#allocation2] sm:$0xff]  ;;  %s746_s8 = smov 112   ;;  %v863_v33 = vand.u32 127, %v335_v24  ;;  %vm369_vm8 = vcmask 130048   ;;  %vm403_vm11 = vcmask 7168   ;;  %s147_s14 = sand.u32 1, %s728_s10  }
  0x28   : > { %s517_s3 = sshll.u32 %s151_s30, 3  ;;  %560 = vmatpush3.xpose.msk.msra.mxu1 %vm165_vm1, %v159_v2  ;;  %550 = vmatprep.subr.mxu0 %v741_v0  ;;  %v338_v27 = vadd.s32 %v337_v26, %v858_v25  ;;  %s516_s16 = sshll.u32 %s147_s14, 3  ;;  %vm414_vm12 = vcmp.eq.s32.totalorder %v858_v25, 0 }
  0x29   : > { %s153_s6 = scalar_lea.vmem %s914_s1, %s517_s3  ;;  %561 = vmatprep.subr.mxu1 %v741_v0  ;;  %v166_v8 = vsel %vm165_vm1, %v164_v6, 0.0  ;;  %630 = vset.pattern.permute.xlu0 %v744_v11  ;;  %vm415_vm13 = vcmp.eq.s32.totalorder %v863_v33, 0  ;;  %s535_s17 = sshll.u32 %s784_s13, 7 }
  0x2a   : > { %v344_v7 = vld [vmem:[%s153_s6] sm:$0xff]  ;;  %167 = vadd.xlane.f32.xlu0 %v166_v8  ;;  %vm339_vm2 = vcmp.lt.s32.totalorder %v338_v27, 16  ;;  %s149_s21 = scalar_lea.vmem [#allocation5], %s516_s16  ;;  %vm416_vm14 = vmand %vm414_vm12, %vm415_vm13  ;;  %s878_s26 = scalar_lea.hbm %s915_s2, %s535_s17 }
  0x2b   : > { %352 = vperm.xlu1 %631, %v344_v7   ;;  %551 = vmatpush3.xpose.msk.msra.mxu0 %vm165_vm1, %v158_v5  ;;  %s434_s22 = sshll.u32 %s149_s21, 4  ;;  %s421_s27 = scalar_lea.sflag [#allocation4], %s147_s14  ;;  %s435_s22 = int_to_ptr.vmem [resolvable:$true] %s434_s22 }
  0x2c   : > { %562 = vmatpush3.xpose.msk.msra.mxu1 %vm165_vm1, %v158_v5  ;;  %552 = vmatprep.subr.mxu0 %v741_v0  ;;  %s672_s28 = scalar_lea.vmem %s435_s22, 128  ;;  %s747_s13 = smov [#allocation5]  }
  0x2d   : > { %563 = vmatprep.subr.mxu1 %v741_v0  ;;  %p673_p8 = scmp.ne.s32.totalorder %s435_s22, %s672_s28  ;;  %s676_s29 = sshll.u32 %s747_s13, 4  ;;  %s677_s29 = int_to_ptr.vmem [resolvable:$false] %s676_s29 }
  0x2e   : > { %s678_s30 = scalar_lea.vmem %s677_s29, 256  ;;  %p679_p11 = scmp.lt.s32.totalorder %s435_s22, %s677_s29 }
  0x2f   : > { %553 = vmatpush3.xpose.msk.msra.mxu0 %vm165_vm1, %v157_v9  ;;  %632 = vset.pattern.permute.xlu1 %v745_v12  ;;  %p674_p9 = pnand %p673_p8, %p801_p5  ;;  %p680_p12 = scmp.lt.s32.totalorder %s678_s30, %s672_s28 }
  0x30   : > { %564 = vmatpush3.xpose.msk.msra.mxu1 %vm165_vm1, %v157_v9  ;;  %554 = vmatprep.subr.mxu0 %v741_v0 }
  0x31   : > { %565 = vmatprep.subr.mxu1 %v741_v0  ;;  %357 = vperm.xlu1 %632, %v344_v7   ;;  %p675_p10 = pneg %p674_p9  ;;  %p681_p13 = por %p680_p12, %p679_p11 }
  0x33   : > { %555 = vmatpush3.xpose.msk.msra.mxu0 %vm165_vm1, %v156_v10  ;;  %p682_p0 = pnand %p681_p13, %p675_p10 }
  0x34   : > { %566 = vmatpush3.xpose.msk.msra.mxu1 %vm165_vm1, %v156_v10 }
  0x36   : > { %557 = vmatmul.mubr.msk.f32.vlgmr.msra.gmra.mxu0 %vm165_vm1, %v161_v3 }
  0x37   : > { %568 = vmatmul.mubr.msk.f32.vlgmr.msra.gmra.mxu1 %vm165_vm1, %v520_v4 }
  0x40   : > { %348 = vperm.xlu0 %630, %v344_v7  }
  0x44   : > { %633 = vset.pattern.permute.xlu0 %v745_v12 }
  0xa6   : > { %v353_v32 = vpop.permute.xlu1 %352 }
  0xa7   : > { %vm354_vm3 = vcmp.eq.s32.totalorder %v863_v33, %v353_v32 }
  0xac   : > { %v358_v35 = vpop.permute.xlu1 %357 }
  0xad   : > { %vm359_vm6 = vcmp.eq.s32.totalorder %v863_v33, %v358_v35 }
  0xb3   : > { %v168_v13 = vpop.xlane.xlu0 %167 }
  0xbb   : > { %v349_v34 = vpop.permute.xlu0 %348 }
  0xbc   : > { %vm350_vm4 = vcmp.eq.s32.totalorder %v863_v33, %v349_v34 }
  0xbd   : > { %vm355_vm5 = vmor %vm350_vm4, %vm354_vm3 }
  0xbe   : > { %vm360_vm7 = vmor %vm355_vm5, %vm359_vm6 }
  0xbf   : > { %v531_v38 = vsel %vm360_vm7, 1.0, %v741_v0 }
  0xf6   : > { %v250_v14 = vpop.f32.mrf.mxu0 }
  0xf7   : > { %v323_v15 = vpop.f32.mrf.mxu1  ;;  %v327_v16 = vsub.f32 %v250_v14, %v168_v13 }
  0xf8   : > { %v331_v17 = vsub.f32 %v323_v15, %v168_v13  ;;  %v558_v18 = vpop.f32.mrf.mxu0 }
  0xf9   : > { %v569_v19 = vpop.f32.mrf.mxu1  ;;  %v328_v20 = vmul.f32 20.0, %v327_v16 }
  0xfa   : > { %v332_v21 = vmul.f32 20.0, %v331_v17 }
  0xfb   : > { %v329_v22 = vmul.f32 1.442695, %v328_v20 }
  0xfc   : > { %v333_v23 = vmul.f32 1.442695, %v332_v21 }
  0xfd   : > { %634 = vpow2.f32 %v329_v22 }
  0xfe   : > { %636 = vpow2.f32 %v333_v23 }
 0x10a   : > { %v635_v28 = vpop.eup %634 }
 0x10b   : > { %v342_v29 = vsel %vm339_vm2, %v635_v28, 0.0  ;;  %v637_v30 = vpop.eup %636 }
 0x10c   : > { %364 = vrot.lane.b32.xlu1 %v342_v29, %s746_s8  ;;  %v343_v31 = vsel %vm339_vm2, %v637_v30, 0.0 }
 0x110   : > { %374 = vrot.lane.b32.xlu1 %v343_v31, %s746_s8 }
 0x17e   : > { %v365_v36 = vpop.permute.xlu1 %364 }
 0x17f   : > { %v367_v37 = vadd.f32 %v365_v36, %v342_v29 }
 0x181   : > { %v368_v39 = vmul.f32 %v531_v38, %v367_v37 }
 0x182   : > { %v375_v40 = vpop.permute.xlu1 %374 }
 0x183   : > { %v377_v41 = vadd.f32 %v375_v40, %v343_v31  ;;  %v370_v42 = vsel %vm369_vm8, %v368_v39, 0.0 }
 0x184   : > { %371 = vadd.xlane.f32.xlu1 %v370_v42 }
 0x185   : > { %v378_v43 = vmul.f32 %v531_v38, %v377_v41 }
 0x187   : > { %v379_v44 = vsel %vm369_vm8, %v378_v43, 0.0 }
 0x188   : > { %380 = vadd.xlane.f32.xlu0 %v379_v44 }
 0x20d   : > { %v372_v45 = vpop.xlane.xlu1 %371 }
 0x20e   : > { %v382_v46 = vadd.f32 1.0, %v372_v45 }
 0x210   : > { %v532_v47 = vadd.f32 -1.0, %v382_v46  ;;  %638 = vlog2.f32 %v382_v46 }
 0x211   : > { %v381_v48 = vpop.xlane.xlu0 %380 }
 0x212   : > { %vm386_vm9 = vcmp.eq.f32.partialorder %v532_v47, 0.0  ;;  %v392_v49 = vadd.f32 1.0, %v381_v48 }
 0x213   : > { %v387_v50 = vsel %vm386_vm9, 1.0, %v532_v47 }
 0x214   : > { %640 = vrcp.f32 %v387_v50  ;;  %v533_v51 = vadd.f32 -1.0, %v392_v49 }
 0x215   : > { %642 = vlog2.f32 %v392_v49 }
 0x216   : > { %vm396_vm10 = vcmp.eq.f32.partialorder %v533_v51, 0.0 }
 0x217   : > { %v397_v52 = vsel %vm396_vm10, 1.0, %v533_v51 }
 0x218   : > { %644 = vrcp.f32 %v397_v52 }
 0x21d   : > { %v639_v53 = vpop.eup %638 }
 0x21e   : > { %v385_v57 = vmul.f32 0.6931472, %v639_v53 }
 0x221   : > { %v641_v54 = vpop.eup %640 }
 0x222   : > { %v389_v55 = vmul.f32 %v641_v54, %v372_v45  ;;  %v643_v56 = vpop.eup %642 }
 0x223   : > { %v395_v60 = vmul.f32 0.6931472, %v643_v56 }
 0x224   : > { %v390_v59 = vmul.f32 %v389_v55, %v385_v57 }
 0x225   : > { %v645_v58 = vpop.eup %644 }
 0x226   : > { %v399_v61 = vmul.f32 %v645_v58, %v381_v48  ;;  %v391_v0 = vsel %vm386_vm9, %v372_v45, %v390_v59 }
 0x228   : > { %v400_v62 = vmul.f32 %v399_v61, %v395_v60 }
 0x22a   : > { %v401_v63 = vsel %vm396_vm10, %v381_v48, %v400_v62 }
 0x22b   : > { %v402_v1 = vadd.f32 %v401_v63, %v391_v0 }
 0x22d   : > { %v404_v2 = vsel %vm403_vm11, %v402_v1, 0.0 }
 0x22e   : > { %405 = vadd.xlane.f32.xlu1 %v404_v2 }
 0x2b7   : > { %v406_v3 = vpop.xlane.xlu1 %405 }
 0x2b8   : > { %v407_v4 = vrot.slane %v406_v3, 4 }
 0x2ba   : > { %v408_v5 = vadd.f32 %v407_v4, %v406_v3 }
 0x2bc   : > { %v409_v6 = vrot.slane %v408_v5, 2 }
 0x2be   : > { %v410_v7 = vadd.f32 %v409_v6, %v408_v5 }
 0x2c0   : > { %v411_v8 = vrot.slane %v410_v7, 1 }
 0x2c2   : > { %v412_v9 = vadd.f32 %v411_v8, %v410_v7 }
 0x2c4   : > { %570 = vpush %v412_v9 }
 0x2f5   : > { %s571_s23 = spop %570 }
 0x2f6   : > { %v417_v10 = vstv %s571_s23 }
 0x2f7   : > { %v418_v11 = vsel %vm416_vm14, %v417_v10, 0.0 }
 0x2f8   : > { %419 = vst [vmem:[%s149_s21] sm:$0xff] %v418_v11 }
 0x2f9   : > { %685 = shalt.err (!%p682_p0)
}
 0x2fa   : > { %s686_s3 = scalar_lea.hbm %s878_s26, 128  ;;  %s690_s6 = scalar_lea.hbm %s915_s2, 256 }
 0x2fb   : > { %p687_p1 = scmp.ne.s32.totalorder %s878_s26, %s686_s3  ;;  %p691_p4 = scmp.lt.s32.totalorder %s878_s26, %s915_s2 }
 0x2fc   : > { %p692_p7 = scmp.lt.s32.totalorder %s690_s6, %s686_s3 }
 0x2fd   : > { %p688_p2 = pnand %p687_p1, %p801_p5 }
 0x2fe   : > { %p693_p6 = por %p692_p7, %p691_p4 }
 0x2ff   : > { %p689_p3 = pneg %p688_p2 }
 0x301   : > { %p694_p8 = pnand %p693_p6, %p689_p3 }
 0x303   : > { %697 = shalt.err (!%p694_p8)
}
 0x304   : > { %576 = dma.vmem_to_hbm [thread:$0]  (%p801_p5), %s435_s22, 128, %s878_s26, %s421_s27  }
 0x305 PF: > { %p588_p9 = scmp.ge.s32.totalorder %s736_s12, 2  ;;  %s446_s14 = sand.u32 1, %s724_s9  }
 0x306   : > { %p919_p10 = scmp.ne.s32.totalorder %s917_s20, 0  ;;  %s447_s16 = scalar_lea.sflag [#allocation4], %s446_s14 }
 0x308   : > { %p583_p11 = pnand %p588_p9, %p919_p10 }
 0x30a   : > { %p584_p12 = pneg %p583_p11 }
 0x30c   : > { %719 = dma.done.wait (%p584_p12), %s447_s16, 128  }
 0x30d   : > { %721 = vsyncadd (%p584_p12), %s447_s16, 4294967168  ;;  %p13_p13 = scmp.ge.s32.totalorder %s788_s15, 4   ;;  %s920_s9 = smov %s728_s10 }
 0x30e   : > { %s921_s10 = smov %s732_s11  ;;  %s922_s11 = smov %s799_s18 }
 0x30f   : > { %s923_s12 = smov %s788_s15  ;;  %15 = sbr.rel (!%p13_p13) target bundleno = 4 (0x4), region = 70 }
 0x314   :  { %452 = vsyncpa [#allocation3], 1 }
 0x315   :  { %454 = vsyncpa [#allocation3 + $0x1], 1 }
 0x316   :  { %455 = vsyncpa [#allocation4], 1 }
 0x317   :  { %457 = vsyncpa [#allocation4 + $0x1], 1 }

</bundles_post_ra>
